<compile_context>
chip_gen: v6e
topology: v6e:2x2x1
jax: 0.10.0
libtpu: 0.0.40
codegen_flags: <defaults>
</compile_context>

<pallas_src>
import functools
import math

import jax
import jax.numpy as jnp
import numpy as np
from jax.experimental import pallas as pl
from jax.experimental.pallas import tpu as pltpu


def _round_up(x, m):
    return (x + m - 1) // m * m


def _masked_mse_kernel(seg_ref, pred_ref, tgt_ref, mask_ref, out_ref, *, rows_total):
    # seg_ref : (L, L) 0/1 "same entity" matrix (constant block, reused every step)
    # pred/tgt/mask refs : (R_blk, L) lane-dense blocks of the flat [B/k, k*T] view
    # out_ref : (1, 128) slot holding this grid step's partial sum (in lane 0)
    rows, _ = pred_ref.shape

    p = pred_ref[...].astype(jnp.float32)   # upcast after load -> f32 math on all chips
    t = tgt_ref[...].astype(jnp.float32)
    m = mask_ref[...].astype(jnp.float32)

    # den[r, l] = sum_t mask[entity(l), t], broadcast back onto every lane of that
    # entity.  Only the 0/1 mask goes through the MXU -> exact at any precision, and
    # the MXU is otherwise idle here.
    den = jnp.dot(m, seg_ref[...], preferred_element_type=jnp.float32)   # (rows, L)

    diff = p - t
    contrib = diff * diff * m / den   # per-element masked SE / its entity's mask sum
    # 0/0 -> NaN when a *real* entity has an all-zero mask (matches the PyTorch ref).

    # Ragged last block: rows >= rows_total were loaded out of bounds and hold
    # unspecified data; select them away (select also discards any NaN/Inf there).
    row_idx = pl.program_id(0) * rows + jax.lax.broadcasted_iota(jnp.int32, (rows, 1), 0)
    contrib = jnp.where(row_idx < rows_total, contrib, 0.0)

    partial = jnp.sum(contrib)        # sum of this tile's per-entity losses

    lane = jax.lax.broadcasted_iota(jnp.int32, (1, 128), 1)
    out_ref[...] = jnp.where(lane == 0, partial, 0.0)   # unmasked 128-lane store


def infectiousness_loss(latent_variable, infectiousness_history, valid_history_mask):
    """latent_variable: [B, T, C]; infectiousness_history: [B, T, 1] (or [B, T]);
    valid_history_mask: [B, T].  Returns the scalar f32 loss."""
    B, T, C = latent_variable.shape

    # --- channel-0 extraction (review item 3) ---
    if C == 1:
        pred2d = latent_variable.reshape(B, T)            # free, fully fused
    else:
        # One XLA slice pass; strided/relayout fusion is worse or riskier for C > 1.
        pred2d = latent_variable[:, :, 0]
    if infectiousness_history.ndim == 3:
        if infectiousness_history.shape[-1] == 1:
            tgt2d = infectiousness_history.reshape(B, T)  # free
        else:
            tgt2d = infectiousness_history[:, :, 0]
    else:
        tgt2d = infectiousness_history
    mask2d = valid_history_mask

    # --- free lane-dense view: [B, T] -> [B/k, k*T] (contiguous reshape, no copy) ---
    k = 128 // math.gcd(T, 128)          # smallest k with (k*T) % 128 == 0
    L = k * T
    B_pad = _round_up(B, k)
    if B_pad != B:
        # Rare fallback (B not a multiple of k): pad < k entities.  Padded entities
        # have pred == tgt == 0 and mask == 1 -> they contribute exactly 0.
        pad = B_pad - B
        pred2d = jnp.pad(pred2d, ((0, pad), (0, 0)))
        tgt2d = jnp.pad(tgt2d, ((0, pad), (0, 0)))
        mask2d = jnp.pad(mask2d, ((0, pad), (0, 0)), constant_values=1)
    R_total = B_pad // k
    pred_f = pred2d.reshape(R_total, L)
    tgt_f = tgt2d.reshape(R_total, L)
    mask_f = mask2d.reshape(R_total, L)

    # 0/1 same-entity matrix (L, L): seg[a, b] = 1 iff lanes a and b lie in the same
    # T-lane entity segment.  Tiny trace-time constant (64 KiB for T = 8).
    ent = np.arange(L) // T
    seg = jnp.asarray(ent[:, None] == ent[None, :], dtype=jnp.float32)

    # --- block sizing (review items 4/5/6) ---
    bytes_per_row = L * (pred_f.dtype.itemsize + tgt_f.dtype.itemsize
                         + mask_f.dtype.itemsize)
    r_budget = max(8, (6 << 20) // bytes_per_row)   # ~6 MiB of input per grid step
    r_half = _round_up(pl.cdiv(R_total, 2), 8)      # >= 2 steps when big enough (v7x)
    R_blk = min(r_budget, r_half)
    if R_blk >= R_total:
        R_blk = R_total                             # single block == full extent
    else:
        R_blk = max(8, (R_blk // 8) * 8)            # whole (8, 128) sublane tiles
    G = pl.cdiv(R_total, R_blk)

    partials = pl.pallas_call(
        functools.partial(_masked_mse_kernel, rows_total=R_total),
        out_shape=jax.ShapeDtypeStruct((1, 128 * G), jnp.float32),
        grid=(G,),
        in_specs=[
            pl.BlockSpec((L, L), lambda i: (0, 0)),       # constant; not re-DMA'd
            pl.BlockSpec((R_blk, L), lambda i: (i, 0)),
            pl.BlockSpec((R_blk, L), lambda i: (i, 0)),
            pl.BlockSpec((R_blk, L), lambda i: (i, 0)),
        ],
        out_specs=pl.BlockSpec((1, 128), lambda i: (0, i)),
        compiler_params=pltpu.CompilerParams(
            dimension_semantics=("parallel",),             # megacore on v7x
            vmem_limit_bytes=32 * 1024 * 1024,
        ),
    )(seg, pred_f, tgt_f, mask_f)

    # Tiny trailing reduce: one 128-lane slot per grid step, then mean over real B.
    return jnp.sum(partials) / B


def _reference(latent_variable, infectiousness_history, valid_history_mask):
    pred = latent_variable[:, :, 0]
    tgt = infectiousness_history[:, :, 0]
    sq = (pred - tgt) ** 2 * valid_history_mask
    return jnp.mean(jnp.sum(sq, axis=-1) / jnp.sum(valid_history_mask, axis=-1))


if __name__ == "__main__":
    B, T, C = 128, 8, 4   # entities, history length, latent width

    key = jax.random.PRNGKey(0)
    k1, k2 = jax.random.split(key)

    latent_variable = jax.random.normal(k1, (B, T, C), dtype=jnp.float32)
    infectiousness_history = jax.random.uniform(k2, (B, T, 1), dtype=jnp.float32)
    # valid-history mask: each entity has 1..T valid leading timesteps (never zero)
    valid_lens = (jnp.arange(B) % T) + 1
    valid_history_mask = (
        jnp.arange(T)[None, :] < valid_lens[:, None]
    ).astype(jnp.float32)

    loss = jax.jit(infectiousness_loss)(
        latent_variable, infectiousness_history, valid_history_mask)
    loss = jax.block_until_ready(loss)

    ref = _reference(latent_variable, infectiousness_history, valid_history_mask)
    np.testing.assert_allclose(np.asarray(loss), np.asarray(ref), rtol=2e-5, atol=1e-6)

    print("KERNEL_OK")
</pallas_src>

<mosaic_0001>
module attributes {stable_mosaic.version = 11 : i64} {
  func.func @_masked_mse_kernel(%arg0: i32, %arg1: memref<128x128xf32, #tpu.memory_space<vmem>>, %arg2: memref<8x128xf32, #tpu.memory_space<vmem>>, %arg3: memref<8x128xf32, #tpu.memory_space<vmem>>, %arg4: memref<8x128xf32, #tpu.memory_space<vmem>>, %arg5: memref<1x128xf32, #tpu.memory_space<vmem>>) attributes {dimension_semantics = [#tpu.dimension_semantics<parallel>], iteration_bounds = array<i64: 1>, scalar_prefetch = 0 : i64, scratch_operands = 0 : i64, tpu.core_type = #tpu.core_type<tc>, window_params = [{pipeline_mode = #tpu.pipeline_mode<synchronous>, transform_indices = @transform_0, window_bounds = array<i64: 128, 128>}, {transform_indices = @transform_1, window_bounds = array<i64: 8, 128>}, {transform_indices = @transform_2, window_bounds = array<i64: 8, 128>}, {transform_indices = @transform_3, window_bounds = array<i64: 8, 128>}, {transform_indices = @transform_4, window_bounds = array<i64: 1, 128>}]} {
    %c0 = arith.constant 0 : index
    %c0_0 = arith.constant 0 : index
    %0 = vector.load %arg2[%c0, %c0_0] : memref<8x128xf32, #tpu.memory_space<vmem>>, vector<8x128xf32>
    %c0_1 = arith.constant 0 : index
    %c0_2 = arith.constant 0 : index
    %1 = vector.load %arg3[%c0_1, %c0_2] : memref<8x128xf32, #tpu.memory_space<vmem>>, vector<8x128xf32>
    %c0_3 = arith.constant 0 : index
    %c0_4 = arith.constant 0 : index
    %2 = vector.load %arg4[%c0_3, %c0_4] : memref<8x128xf32, #tpu.memory_space<vmem>>, vector<8x128xf32>
    %c0_5 = arith.constant 0 : index
    %c0_6 = arith.constant 0 : index
    %3 = vector.load %arg1[%c0_5, %c0_6] : memref<128x128xf32, #tpu.memory_space<vmem>>, vector<128x128xf32>
    %cst = arith.constant dense<0.000000e+00> : vector<8x128xf32>
    %4 = tpu.matmul %2, %3, %cst {dimension_numbers = #tpu.dot_dimension_numbers<[1], [0], [0], [1], [0, 0, 1, 1], [], []>} : vector<8x128xf32>, vector<128x128xf32>, vector<8x128xf32> -> vector<8x128xf32>
    %5 = arith.subf %0, %1 : vector<8x128xf32>
    %6 = arith.mulf %5, %5 : vector<8x128xf32>
    %7 = arith.mulf %6, %2 : vector<8x128xf32>
    %8 = arith.divf %7, %4 : vector<8x128xf32>
    %c8_i32 = arith.constant 8 : i32
    %9 = arith.muli %arg0, %c8_i32 : i32
    %10 = tpu.iota {dimensions = array<i32: 0>} : vector<8x1xi32>
    %11 = vector.broadcast %9 : i32 to vector<8x1xi32>
    %12 = arith.addi %11, %10 : vector<8x1xi32>
    %c8_i32_7 = arith.constant 8 : i32
    %13 = vector.broadcast %c8_i32_7 : i32 to vector<8x1xi32>
    %14 = arith.cmpi slt, %12, %13 : vector<8x1xi32>
    %cst_8 = arith.constant 0.000000e+00 : f32
    %15 = vector.shape_cast %14 : vector<8x1xi1> to vector<8x1xi1>
    %16 = vector.broadcast %15 : vector<8x1xi1> to vector<8x128xi1>
    %17 = vector.broadcast %cst_8 : f32 to vector<8x128xf32>
    %18 = arith.select %16, %8, %17 : vector<8x128xi1>, vector<8x128xf32>
    %19 = vector.shape_cast %18 : vector<8x128xf32> to vector<1x8x128xf32>
    %cst_9 = arith.constant dense<0.000000e+00> : vector<1xf32>
    %20 = vector.multi_reduction <add>, %19, %cst_9 [1, 2] : vector<1x8x128xf32> to vector<1xf32>
    %21 = vector.shape_cast %20 : vector<1xf32> to vector<1x1x1xf32>
    %22 = vector.extract %21[0, 0, 0] : f32 from vector<1x1x1xf32>
    %23 = tpu.iota {dimensions = array<i32: 1>} : vector<1x128xi32>
    %c0_i32 = arith.constant 0 : i32
    %24 = vector.broadcast %c0_i32 : i32 to vector<1x128xi32>
    %25 = arith.cmpi eq, %23, %24 : vector<1x128xi32>
    %cst_10 = arith.constant 0.000000e+00 : f32
    %26 = vector.broadcast %22 : f32 to vector<1x128xf32>
    %27 = vector.broadcast %cst_10 : f32 to vector<1x128xf32>
    %28 = arith.select %25, %26, %27 : vector<1x128xi1>, vector<1x128xf32>
    %c0_11 = arith.constant 0 : index
    %c0_12 = arith.constant 0 : index
    %29 = vector.load %arg5[%c0_11, %c0_12] : memref<1x128xf32, #tpu.memory_space<vmem>>, vector<1x128xf32>
    tpu.vector_store %arg5[%c0_11, %c0_12], %28 {strides = array<i32>} : memref<1x128xf32, #tpu.memory_space<vmem>>, vector<1x128xf32>,
    return
  }
  func.func @transform_0(%arg0: i32) -> (i32, i32) {
    %c0_i32 = arith.constant 0 : i32
    %c0_i32_0 = arith.constant 0 : i32
    %c0_i32_1 = arith.constant 0 : i32
    return %c0_i32, %c0_i32_0 : i32, i32
  }
  func.func @transform_1(%arg0: i32) -> (i32, i32) {
    %c0_i32 = arith.constant 0 : i32
    %c0_i32_0 = arith.constant 0 : i32
    return %arg0, %c0_i32 : i32, i32
  }
  func.func @transform_2(%arg0: i32) -> (i32, i32) {
    %c0_i32 = arith.constant 0 : i32
    %c0_i32_0 = arith.constant 0 : i32
    return %arg0, %c0_i32 : i32, i32
  }
  func.func @transform_3(%arg0: i32) -> (i32, i32) {
    %c0_i32 = arith.constant 0 : i32
    %c0_i32_0 = arith.constant 0 : i32
    return %arg0, %c0_i32 : i32, i32
  }
  func.func @transform_4(%arg0: i32) -> (i32, i32) {
    %c0_i32 = arith.constant 0 : i32
    %c0_i32_0 = arith.constant 0 : i32
    return %c0_i32, %arg0 : i32, i32
  }
}

</mosaic_0001>

<bundles_post_ra>
// kernel: squeeze.1
= control target key start
LH: loop header
LB: loop body
LE: loop exit
PB: predicated region body
PF: predicated region fallthrough
CT: control target
= control target key end

     0   :  { %vm6_vm0 = vcmask 1043458   ;;  %vm10_vm1 = vcmask 1045508   ;;  %vm14_vm2 = vcmask 1047558   ;;  %s19_s6 = smov 3  ;;  %s22_s7 = smov 12  ;;  %vm16_vm3 = vcmask 64512   ;;  %s736_s0 = inlined_call_operand.vmem [shape: f32[128,8,1], index: 0, kind: input, shape index: {}]   ;;  %s737_s1 = inlined_call_operand.vmem [shape: f32[8,128], index: 1, kind: output, shape index: {}]  }
   0x1   :  { %v348_v0 = vld [vmem:[%s736_s0 + $0xf] ss:$16 sm:%s19_s6]   ;;  %s27_s12 = smov 48  ;;  %s32_s13 = smov 192  ;;  %vm38_vm4 = vcmask 1048512   ;;  %vm60_vm5 = vcmask 982912  }
   0x2   :  { %v349_v1 = vld [vmem:[%s736_s0 + $0xf] ss:$16 sm:%s22_s7]   ;;  %s63_s18 = smov 3  ;;  %s66_s21 = smov 12  ;;  %vm82_vm6 = vcmask 917312   ;;  %vm104_vm7 = vcmask 851712  }
   0x3   :  { %v25_v2 = vsel %vm6_vm0, %v349_v1, %v348_v0  ;;  %v350_v3 = vld [vmem:[%s736_s0 + $0xf] ss:$16 sm:%s27_s12]   ;;  %v356_v6 = vld [vmem:[%s736_s0 + $0xd] ss:$16 sm:%s63_s18]   ;;  %s71_s22 = smov 48  ;;  %s76_s27 = smov 192 }
   0x4   :  { %v351_v4 = vld [vmem:[%s736_s0 + $0xf] ss:$16 sm:%s32_s13]   ;;  %v30_v5 = vsel %vm10_vm1, %v350_v3, %v25_v2  ;;  %v357_v8 = vld [vmem:[%s736_s0 + $0xd] ss:$16 sm:%s66_s21]   ;;  %s423_s28 = smov 120   ;;  %s41_s2 = smov 3 }
   0x5   :  { %v35_v7 = vsel %vm14_vm2, %v351_v4, %v30_v5  ;;  %v358_v9 = vld [vmem:[%s736_s0 + $0xd] ss:$16 sm:%s71_s22]   ;;  %v69_v10 = vsel %vm6_vm0, %v357_v8, %v356_v6  ;;  %s44_s3 = smov 12  ;;  %v352_v13 = vld [vmem:[%s736_s0 + $0xe] ss:$16 sm:%s41_s2]   ;;  %s49_s8 = smov 48 }
   0x6   :  { %36 = vrot.lane.b32.xlu0 %v35_v7, %s423_s28  ;;  %v359_v11 = vld [vmem:[%s736_s0 + $0xd] ss:$16 sm:%s76_s27]   ;;  %v74_v12 = vsel %vm10_vm1, %v358_v9, %v69_v10  ;;  %s54_s9 = smov 192  ;;  %s85_s14 = smov 3  ;;  %vm126_vm8 = vcmask 786112   ;;  %vm148_vm9 = vcmask 720512  }
   0x7   :  { %v353_v14 = vld [vmem:[%s736_s0 + $0xe] ss:$16 sm:%s44_s3]   ;;  %v79_v15 = vsel %vm14_vm2, %v359_v11, %v74_v12  ;;  %s424_s15 = smov 104   ;;  %v360_v20 = vld [vmem:[%s736_s0 + $0xc] ss:$16 sm:%s85_s14]   ;;  %s88_s18 = smov 12 }
   0x8   :  { %v47_v16 = vsel %vm6_vm0, %v353_v14, %v352_v13  ;;  %v354_v17 = vld [vmem:[%s736_s0 + $0xe] ss:$16 sm:%s49_s8]   ;;  %80 = vrot.lane.b32.xlu1 %v79_v15, %s424_s15  ;;  %s93_s19 = smov 48  ;;  %s98_s24 = smov 192  ;;  %vm170_vm10 = vcmask 654912   ;;  %vm192_vm11 = vcmask 589312  }
   0x9   :  { %v355_v18 = vld [vmem:[%s736_s0 + $0xe] ss:$16 sm:%s54_s9]   ;;  %v52_v19 = vsel %vm10_vm1, %v354_v17, %v47_v16  ;;  %v361_v22 = vld [vmem:[%s736_s0 + $0xc] ss:$16 sm:%s88_s18]   ;;  %s425_s25 = smov 112   ;;  %s107_s28 = smov 3 }
   0xa   :  { %v57_v21 = vsel %vm14_vm2, %v355_v18, %v52_v19  ;;  %v362_v23 = vld [vmem:[%s736_s0 + $0xc] ss:$16 sm:%s93_s19]   ;;  %v91_v24 = vsel %vm6_vm0, %v361_v22, %v360_v20  ;;  %s110_s29 = smov 12  ;;  %v364_v27 = vld [vmem:[%s736_s0 + $0xb] ss:$16 sm:%s107_s28]   ;;  %s115_s5 = smov 48 }
   0xb   :  { %58 = vrot.lane.b32.xlu0 %v57_v21, %s425_s25  ;;  %v363_v25 = vld [vmem:[%s736_s0 + $0xc] ss:$16 sm:%s98_s24]   ;;  %v96_v26 = vsel %vm10_vm1, %v362_v23, %v91_v24  ;;  %s120_s6 = smov 192  ;;  %s129_s11 = smov 3  ;;  %vm214_vm12 = vcmask 523712   ;;  %vm236_vm13 = vcmask 458112  }
   0xc   :  { %v365_v28 = vld [vmem:[%s736_s0 + $0xb] ss:$16 sm:%s110_s29]   ;;  %v101_v29 = vsel %vm14_vm2, %v363_v25, %v96_v26  ;;  %s426_s12 = smov 96   ;;  %v368_v34 = vld [vmem:[%s736_s0 + $0xa] ss:$16 sm:%s129_s11]   ;;  %s132_s15 = smov 12 }
   0xd   :  { %v113_v30 = vsel %vm6_vm0, %v365_v28, %v364_v27  ;;  %v366_v31 = vld [vmem:[%s736_s0 + $0xb] ss:$16 sm:%s115_s5]   ;;  %102 = vrot.lane.b32.xlu1 %v101_v29, %s426_s12  ;;  %s137_s16 = smov 48  ;;  %s142_s21 = smov 192  ;;  %vm258_vm14 = vcmask 392512   ;;  %vm280_vm15 = vcmask 326912  }
   0xe   :  { %v367_v32 = vld [vmem:[%s736_s0 + $0xb] ss:$16 sm:%s120_s6]   ;;  %v118_v33 = vsel %vm10_vm1, %v366_v31, %v113_v30  ;;  %v369_v36 = vld [vmem:[%s736_s0 + $0xa] ss:$16 sm:%s132_s15]   ;;  %s427_s22 = smov 88   ;;  %s151_s25 = smov 3 }
   0xf   :  { %v123_v35 = vsel %vm14_vm2, %v367_v32, %v118_v33  ;;  %v370_v37 = vld [vmem:[%s736_s0 + $0xa] ss:$16 sm:%s137_s16]   ;;  %v135_v38 = vsel %vm6_vm0, %v369_v36, %v368_v34  ;;  %s154_s26 = smov 12  ;;  %v372_v41 = vld [vmem:[%s736_s0 + $0x9] ss:$16 sm:%s151_s25]   ;;  %s159_s2 = smov 48 }
  0x10   :  { %124 = vrot.lane.b32.xlu0 %v123_v35, %s427_s22  ;;  %v371_v39 = vld [vmem:[%s736_s0 + $0xa] ss:$16 sm:%s142_s21]   ;;  %v140_v40 = vsel %vm10_vm1, %v370_v37, %v135_v38  ;;  %s164_s3 = smov 192  ;;  %s173_s8 = smov 3 }
  0x11   :  { %v373_v42 = vld [vmem:[%s736_s0 + $0x9] ss:$16 sm:%s154_s26]   ;;  %v145_v43 = vsel %vm14_vm2, %v371_v39, %v140_v40  ;;  %s428_s9 = smov 80   ;;  %v376_v48 = vld [vmem:[%s736_s0 + $0x8] ss:$16 sm:%s173_s8]   ;;  %s176_s12 = smov 12 }
  0x12   :  { %v157_v44 = vsel %vm6_vm0, %v373_v42, %v372_v41  ;;  %v374_v45 = vld [vmem:[%s736_s0 + $0x9] ss:$16 sm:%s159_s2]   ;;  %146 = vrot.lane.b32.xlu1 %v145_v43, %s428_s9  ;;  %s181_s13 = smov 48  ;;  %s186_s18 = smov 192 }
  0x13   :  { %v375_v46 = vld [vmem:[%s736_s0 + $0x9] ss:$16 sm:%s164_s3]   ;;  %v162_v47 = vsel %vm10_vm1, %v374_v45, %v157_v44  ;;  %v377_v50 = vld [vmem:[%s736_s0 + $0x8] ss:$16 sm:%s176_s12]   ;;  %s429_s19 = smov 72   ;;  %s195_s22 = smov 3 }
  0x14   :  { %v167_v49 = vsel %vm14_vm2, %v375_v46, %v162_v47  ;;  %v378_v51 = vld [vmem:[%s736_s0 + $0x8] ss:$16 sm:%s181_s13]   ;;  %v179_v52 = vsel %vm6_vm0, %v377_v50, %v376_v48  ;;  %s198_s23 = smov 12  ;;  %v380_v55 = vld [vmem:[%s736_s0 + $0x7] ss:$16 sm:%s195_s22]   ;;  %s203_s28 = smov 48 }
  0x15   :  { %168 = vrot.lane.b32.xlu0 %v167_v49, %s429_s19  ;;  %v379_v53 = vld [vmem:[%s736_s0 + $0x8] ss:$16 sm:%s186_s18]   ;;  %v184_v54 = vsel %vm10_vm1, %v378_v51, %v179_v52  ;;  %s208_s29 = smov 192  ;;  %s217_s5 = smov 3 }
  0x16   :  { %v381_v56 = vld [vmem:[%s736_s0 + $0x7] ss:$16 sm:%s198_s23]   ;;  %v189_v57 = vsel %vm14_vm2, %v379_v53, %v184_v54  ;;  %s430_s6 = smov 64   ;;  %v384_v62 = vld [vmem:[%s736_s0 + $0x6] ss:$16 sm:%s217_s5]   ;;  %s220_s9 = smov 12 }
  0x17   :  { %v201_v58 = vsel %vm6_vm0, %v381_v56, %v380_v55  ;;  %v382_v59 = vld [vmem:[%s736_s0 + $0x7] ss:$16 sm:%s203_s28]   ;;  %190 = vrot.lane.b32.xlu1 %v189_v57, %s430_s6  ;;  %s225_s10 = smov 48  ;;  %s230_s15 = smov 192 }
  0x18   :  { %v383_v60 = vld [vmem:[%s736_s0 + $0x7] ss:$16 sm:%s208_s29]   ;;  %v206_v61 = vsel %vm10_vm1, %v382_v59, %v201_v58  ;;  %v385_v0 = vld [vmem:[%s736_s0 + $0x6] ss:$16 sm:%s220_s9]   ;;  %s431_s16 = smov 56   ;;  %s239_s19 = smov 3 }
  0x19   :  { %v211_v63 = vsel %vm14_vm2, %v383_v60, %v206_v61  ;;  %v386_v1 = vld [vmem:[%s736_s0 + $0x6] ss:$16 sm:%s225_s10]   ;;  %v223_v2 = vsel %vm6_vm0, %v385_v0, %v384_v62  ;;  %s242_s20 = smov 12  ;;  %v388_v5 = vld [vmem:[%s736_s0 + $0x5] ss:$16 sm:%s239_s19]   ;;  %s247_s25 = smov 48 }
  0x1a   :  { %212 = vrot.lane.b32.xlu0 %v211_v63, %s431_s16  ;;  %v387_v3 = vld [vmem:[%s736_s0 + $0x6] ss:$16 sm:%s230_s15]   ;;  %v228_v4 = vsel %vm10_vm1, %v386_v1, %v223_v2  ;;  %s252_s26 = smov 192  ;;  %s261_s2 = smov 3 }
  0x1b   :  { %v389_v6 = vld [vmem:[%s736_s0 + $0x5] ss:$16 sm:%s242_s20]   ;;  %v233_v7 = vsel %vm14_vm2, %v387_v3, %v228_v4  ;;  %s432_s3 = smov 48   ;;  %v392_v12 = vld [vmem:[%s736_s0 + $0x4] ss:$16 sm:%s261_s2]   ;;  %s264_s6 = smov 12 }
  0x1c   :  { %v245_v8 = vsel %vm6_vm0, %v389_v6, %v388_v5  ;;  %v390_v9 = vld [vmem:[%s736_s0 + $0x5] ss:$16 sm:%s247_s25]   ;;  %234 = vrot.lane.b32.xlu1 %v233_v7, %s432_s3  ;;  %s269_s7 = smov 48  ;;  %s274_s12 = smov 192 }
  0x1d   :  { %v391_v10 = vld [vmem:[%s736_s0 + $0x5] ss:$16 sm:%s252_s26]   ;;  %v250_v11 = vsel %vm10_vm1, %v390_v9, %v245_v8  ;;  %v393_v14 = vld [vmem:[%s736_s0 + $0x4] ss:$16 sm:%s264_s6]   ;;  %s433_s13 = smov 40   ;;  %s283_s16 = smov 3 }
  0x1e   :  { %v255_v13 = vsel %vm14_vm2, %v391_v10, %v250_v11  ;;  %v394_v15 = vld [vmem:[%s736_s0 + $0x4] ss:$16 sm:%s269_s7]   ;;  %v267_v16 = vsel %vm6_vm0, %v393_v14, %v392_v12  ;;  %s286_s17 = smov 12  ;;  %v396_v19 = vld [vmem:[%s736_s0 + $0x3] ss:$16 sm:%s283_s16]   ;;  %s291_s22 = smov 48 }
  0x1f   :  { %256 = vrot.lane.b32.xlu0 %v255_v13, %s433_s13  ;;  %v395_v17 = vld [vmem:[%s736_s0 + $0x4] ss:$16 sm:%s274_s12]   ;;  %v272_v18 = vsel %vm10_vm1, %v394_v15, %v267_v16  ;;  %s296_s23 = smov 192  ;;  %s305_s28 = smov 3 }
  0x20   :  { %v397_v20 = vld [vmem:[%s736_s0 + $0x3] ss:$16 sm:%s286_s17]   ;;  %v277_v21 = vsel %vm14_vm2, %v395_v17, %v272_v18  ;;  %s434_s29 = smov 32   ;;  %v400_v26 = vld [vmem:[%s736_s0 + $0x2] ss:$16 sm:%s305_s28]   ;;  %s308_s3 = smov 12 }
  0x21   :  { %v289_v22 = vsel %vm6_vm0, %v397_v20, %v396_v19  ;;  %v398_v23 = vld [vmem:[%s736_s0 + $0x3] ss:$16 sm:%s291_s22]   ;;  %278 = vrot.lane.b32.xlu1 %v277_v21, %s434_s29  ;;  %s313_s4 = smov 48  ;;  %s318_s9 = smov 192 }
  0x22   :  { %v399_v24 = vld [vmem:[%s736_s0 + $0x3] ss:$16 sm:%s296_s23]   ;;  %v294_v25 = vsel %vm10_vm1, %v398_v23, %v289_v22  ;;  %v401_v28 = vld [vmem:[%s736_s0 + $0x2] ss:$16 sm:%s308_s3]   ;;  %s435_s10 = smov 24   ;;  %s327_s13 = smov 3 }
  0x23   :  { %v299_v27 = vsel %vm14_vm2, %v399_v24, %v294_v25  ;;  %v402_v29 = vld [vmem:[%s736_s0 + $0x2] ss:$16 sm:%s313_s4]   ;;  %v311_v30 = vsel %vm6_vm0, %v401_v28, %v400_v26  ;;  %s330_s14 = smov 12  ;;  %v404_v33 = vld [vmem:[%s736_s0 + $0x1] ss:$16 sm:%s327_s13]   ;;  %s335_s19 = smov 48 }
  0x24   :  { %300 = vrot.lane.b32.xlu0 %v299_v27, %s435_s10  ;;  %v403_v31 = vld [vmem:[%s736_s0 + $0x2] ss:$16 sm:%s318_s9]   ;;  %v316_v32 = vsel %vm10_vm1, %v402_v29, %v311_v30  ;;  %s340_s20 = smov 192  ;;  %s2_s25 = smov 3 }
  0x25   :  { %v405_v34 = vld [vmem:[%s736_s0 + $0x1] ss:$16 sm:%s330_s14]   ;;  %v321_v35 = vsel %vm14_vm2, %v403_v31, %v316_v32  ;;  %s436_s26 = smov 16   ;;  %s4_s27 = smov 12  ;;  %v3_v40 = vld [vmem:[%s736_s0] ss:$16 sm:%s2_s25]  }
  0x26   :  { %v333_v36 = vsel %vm6_vm0, %v405_v34, %v404_v33  ;;  %v406_v37 = vld [vmem:[%s736_s0 + $0x1] ss:$16 sm:%s335_s19]   ;;  %322 = vrot.lane.b32.xlu1 %v321_v35, %s436_s26  ;;  %s8_s28 = smov 48  ;;  %s12_s2 = smov 192 }
  0x27   :  { %v407_v38 = vld [vmem:[%s736_s0 + $0x1] ss:$16 sm:%s340_s20]   ;;  %v338_v39 = vsel %vm10_vm1, %v406_v37, %v333_v36  ;;  %v5_v42 = vld [vmem:[%s736_s0] ss:$16 sm:%s4_s27]   ;;  %s437_s7 = smov 8  }
  0x28   :  { %v343_v41 = vsel %vm14_vm2, %v407_v38, %v338_v39  ;;  %v9_v43 = vld [vmem:[%s736_s0] ss:$16 sm:%s8_s28]   ;;  %v7_v44 = vsel %vm6_vm0, %v5_v42, %v3_v40  ;;  %vm302_vm0 = vcmask 261312  }
  0x29   :  { %344 = vrot.lane.b32.xlu0 %v343_v41, %s437_s7  ;;  %v13_v45 = vld [vmem:[%s736_s0] ss:$16 sm:%s12_s2]   ;;  %v11_v46 = vsel %vm10_vm1, %v9_v43, %v7_v44  ;;  %vm324_vm1 = vcmask 195712  }
  0x2a   :  { %v15_v47 = vsel %vm14_vm2, %v13_v45, %v11_v46  ;;  %vm346_vm2 = vcmask 130112  }
  0x2b   :  { %17 = vst.msk [vmem:[%s737_s1] sm:$0xff] %vm16_vm3, %v15_v47  }
  0x78   :  { %v37_v48 = vpop.permute.xlu0 %36  }
  0x79   :  { %39 = vst.msk [vmem:[%s737_s1] sm:$0xff] %vm38_vm4, %v37_v48  }
  0x7a   :  { %v81_v49 = vpop.permute.xlu1 %80  }
  0x7d   :  { %v59_v50 = vpop.permute.xlu0 %58  }
  0x7e   :  { %61 = vst.msk [vmem:[%s737_s1] sm:$0xff] %vm60_vm5, %v59_v50  }
  0x7f   :  { %83 = vst.msk [vmem:[%s737_s1] sm:$0xff] %vm82_vm6, %v81_v49   ;;  %v103_v51 = vpop.permute.xlu1 %102  }
  0x80   :  { %105 = vst.msk [vmem:[%s737_s1] sm:$0xff] %vm104_vm7, %v103_v51  }
  0x82   :  { %v125_v52 = vpop.permute.xlu0 %124  }
  0x83   :  { %127 = vst.msk [vmem:[%s737_s1] sm:$0xff] %vm126_vm8, %v125_v52  }
  0x84   :  { %v147_v53 = vpop.permute.xlu1 %146  }
  0x85   :  { %149 = vst.msk [vmem:[%s737_s1] sm:$0xff] %vm148_vm9, %v147_v53  }
  0x87   :  { %v169_v54 = vpop.permute.xlu0 %168  }
  0x88   :  { %171 = vst.msk [vmem:[%s737_s1] sm:$0xff] %vm170_vm10, %v169_v54  }
  0x89   :  { %v191_v55 = vpop.permute.xlu1 %190  }
  0x8a   :  { %193 = vst.msk [vmem:[%s737_s1] sm:$0xff] %vm192_vm11, %v191_v55  }
  0x8c   :  { %v213_v56 = vpop.permute.xlu0 %212  }
  0x8d   :  { %215 = vst.msk [vmem:[%s737_s1] sm:$0xff] %vm214_vm12, %v213_v56  }
  0x8e   :  { %v235_v57 = vpop.permute.xlu1 %234  }
  0x8f   :  { %237 = vst.msk [vmem:[%s737_s1] sm:$0xff] %vm236_vm13, %v235_v57  }
  0x91   :  { %v257_v58 = vpop.permute.xlu0 %256  }
  0x92   :  { %259 = vst.msk [vmem:[%s737_s1] sm:$0xff] %vm258_vm14, %v257_v58  }
  0x93   :  { %v279_v59 = vpop.permute.xlu1 %278  }
  0x94   :  { %281 = vst.msk [vmem:[%s737_s1] sm:$0xff] %vm280_vm15, %v279_v59  }
  0x96   :  { %v301_v60 = vpop.permute.xlu0 %300  }
  0x97   :  { %303 = vst.msk [vmem:[%s737_s1] sm:$0xff] %vm302_vm0, %v301_v60  }
  0x98   :  { %v323_v61 = vpop.permute.xlu1 %322  }
  0x99   :  { %325 = vst.msk [vmem:[%s737_s1] sm:$0xff] %vm324_vm1, %v323_v61  }
  0x9b   :  { %v345_v62 = vpop.permute.xlu0 %344  }
  0x9c   :  { %347 = vst.msk [vmem:[%s737_s1] sm:$0xff] %vm346_vm2, %v345_v62  }

// kernel: infectiousness_loss.1
= control target key start
LH: loop header
LB: loop body
LE: loop exit
PB: predicated region body
PF: predicated region fallthrough
CT: control target
= control target key end

     0   :  { %v197_v0 = vmov 0.0   ;;  %vm198_vm0 = vmmov 0   ;;  %v129_v34 = vlaneseq  ;;  %s284_s0 = inlined_call_operand.vmem [shape: f32[128,128], index: 0, kind: input, shape index: {}]   ;;  %s285_s3 = inlined_call_operand.vmem [shape: f32[8,128], index: 3, kind: input, shape index: {}]   ;;  %s286_s1 = inlined_call_operand.vmem [shape: f32[8,128], index: 1, kind: input, shape index: {}]   ;;  %s287_s2 = inlined_call_operand.vmem [shape: f32[8,128], index: 2, kind: input, shape index: {}]   ;;  %s288_s4 = inlined_call_operand.vmem [shape: f32[1,128], index: 4, kind: output, shape index: {}]  }
   0x1   :  { %156 = vmatprep.subr.mxu0 %v197_v0  ;;  %v35_v1 = vld [vmem:[%s284_s0 + $0x78] sm:$0xff]  ;;  %v34_v2 = vld [vmem:[%s284_s0 + $0x70] sm:$0xff]  ;;  %188 = vmatprep.mubr.msk.f32.mxu0 %vm198_vm0, %v197_v0  ;;  %v33_v3 = vld [vmem:[%s284_s0 + $0x68] sm:$0xff] }
   0x2   :  { %157 = vmatpush3.msra.mxu0 %v35_v1  ;;  %v32_v4 = vld [vmem:[%s284_s0 + $0x60] sm:$0xff]  ;;  %v31_v5 = vld [vmem:[%s284_s0 + $0x58] sm:$0xff]  ;;  %v30_v6 = vld [vmem:[%s284_s0 + $0x50] sm:$0xff]  ;;  %v130_v35 = vand.u32 127, %v129_v34 }
   0x3   :  { %158 = vmatprep.subr.mxu0 %v197_v0  ;;  %v29_v7 = vld [vmem:[%s284_s0 + $0x48] sm:$0xff]  ;;  %v28_v8 = vld [vmem:[%s284_s0 + $0x40] sm:$0xff]  ;;  %v27_v9 = vld [vmem:[%s284_s0 + $0x38] sm:$0xff] }
   0x4   :  { %159 = vmatpush3.msra.mxu0 %v34_v2  ;;  %v26_v10 = vld [vmem:[%s284_s0 + $0x30] sm:$0xff]  ;;  %v25_v11 = vld [vmem:[%s284_s0 + $0x28] sm:$0xff]  ;;  %v24_v12 = vld [vmem:[%s284_s0 + $0x20] sm:$0xff]  ;;  %vm131_vm1 = vcmp.eq.s32.totalorder %v130_v35, 0 }
   0x5   :  { %160 = vmatprep.subr.mxu0 %v197_v0  ;;  %v23_v13 = vld [vmem:[%s284_s0 + $0x18] sm:$0xff]  ;;  %v22_v14 = vld [vmem:[%s284_s0 + $0x10] sm:$0xff]  ;;  %v21_v15 = vld [vmem:[%s284_s0 + $0x8] sm:$0xff] }
   0x6   :  { %161 = vmatpush3.msra.mxu0 %v33_v3  ;;  %v20_v16 = vld [vmem:[%s284_s0] sm:$0xff] }
   0x7   :  { %162 = vmatprep.subr.mxu0 %v197_v0  ;;  %v19_v17 = vld [vmem:[%s285_s3] sm:$0xff] }
   0x8   :  { %163 = vmatpush3.msra.mxu0 %v32_v4  ;;  %v17_v19 = vld [vmem:[%s286_s1] sm:$0xff] }
   0x9   :  { %164 = vmatprep.subr.mxu0 %v197_v0  ;;  %v18_v20 = vld [vmem:[%s287_s2] sm:$0xff] }
   0xa   :  { %165 = vmatpush3.msra.mxu0 %v31_v5  ;;  %v106_v22 = vsub.f32 %v17_v19, %v18_v20 }
   0xb   :  { %166 = vmatprep.subr.mxu0 %v197_v0 }
   0xc   :  { %167 = vmatpush3.msra.mxu0 %v30_v6  ;;  %v107_v23 = vmul.f32 %v106_v22, %v106_v22 }
   0xd   :  { %168 = vmatprep.subr.mxu0 %v197_v0 }
   0xe   :  { %169 = vmatpush3.msra.mxu0 %v29_v7  ;;  %v108_v24 = vmul.f32 %v107_v23, %v19_v17 }
   0xf   :  { %170 = vmatprep.subr.mxu0 %v197_v0 }
  0x10   :  { %171 = vmatpush3.msra.mxu0 %v28_v8 }
  0x11   :  { %172 = vmatprep.subr.mxu0 %v197_v0 }
  0x12   :  { %173 = vmatpush3.msra.mxu0 %v27_v9 }
  0x13   :  { %174 = vmatprep.subr.mxu0 %v197_v0 }
  0x14   :  { %175 = vmatpush3.msra.mxu0 %v26_v10 }
  0x15   :  { %176 = vmatprep.subr.mxu0 %v197_v0 }
  0x16   :  { %177 = vmatpush3.msra.mxu0 %v25_v11 }
  0x17   :  { %178 = vmatprep.subr.mxu0 %v197_v0 }
  0x18   :  { %179 = vmatpush3.msra.mxu0 %v24_v12 }
  0x19   :  { %180 = vmatprep.subr.mxu0 %v197_v0 }
  0x1a   :  { %181 = vmatpush3.msra.mxu0 %v23_v13 }
  0x1b   :  { %182 = vmatprep.subr.mxu0 %v197_v0 }
  0x1c   :  { %183 = vmatpush3.msra.mxu0 %v22_v14 }
  0x1d   :  { %184 = vmatprep.subr.mxu0 %v197_v0 }
  0x1e   :  { %185 = vmatpush3.msra.mxu0 %v21_v15 }
  0x1f   :  { %186 = vmatprep.subr.mxu0 %v197_v0 }
  0x20   :  { %187 = vmatpush3.msra.mxu0 %v20_v16 }
  0x21   :  { %189 = vmatmul.mubr.f32.vlgmr.msra.gmra.mxu0 %v19_v17 }
  0xe1   :  { %v102_v18 = vpop.f32.mrf.mxu0 }
  0xe2   :  { %195 = vrcp.f32 %v102_v18 }
  0xe3   :  { %v190_v21 = vpop.f32.mrf.mxu0 }
  0xef   :  { %v196_v25 = vpop.eup %195 }
  0xf0   :  { %v110_v26 = vmul.f32 %v196_v25, %v108_v24 }
  0xf2   :  { %120 = vadd.xlane.f32.xlu0 %v110_v26 }
 0x17b   :  { %v121_v27 = vpop.xlane.xlu0 %120 }
 0x17c   :  { %v122_v28 = vrot.slane %v121_v27, 4 }
 0x17e   :  { %v123_v29 = vadd.f32 %v122_v28, %v121_v27 }
 0x180   :  { %v124_v30 = vrot.slane %v123_v29, 2 }
 0x182   :  { %v125_v31 = vadd.f32 %v124_v30, %v123_v29 }
 0x184   :  { %v126_v32 = vrot.slane %v125_v31, 1 }
 0x186   :  { %v127_v33 = vadd.f32 %v126_v32, %v125_v31 }
 0x188   :  { %191 = vpush %v127_v33 }
 0x1b9   :  { %s192_s0 = spop %191 }
 0x1ba   :  { %v132_v36 = vstv %s192_s0 }
 0x1bb   :  { %v133_v37 = vsel %vm131_vm1, %v132_v36, 0.0 }
 0x1bc   :  { %134 = vst [vmem:[%s288_s4] sm:$0x1] %v133_v37 }

</bundles_post_ra>
